<compile_context>
chip_gen: v7x
topology: tpu7x:2x2x1
jax: 0.10.0
libtpu: 0.0.40
codegen_flags: <defaults>
</compile_context>

<pallas_src>
import math

import jax
import jax.numpy as jnp
from jax.experimental import pallas as pl
from jax.experimental.pallas import tpu as pltpu


def _round_up(x, m):
    return ((x + m - 1) // m) * m


def gcn_layer_with_virtual_node(H, edge_index, batch, W, num_graphs, *, tile=512):
    """Pallas implementation of GCNLayerWithVirtualNode.forward."""
    N, F_in = H.shape
    F_out = W.shape[1]
    f32, bf16 = jnp.float32, jnp.bfloat16

    # Equal square tiles (tm == tk) so padding is capped at t-1 rows; clamp for
    # tiny problems so we do not pad N to 512.
    t = min(tile, _round_up(N, 128))
    N_pad = _round_up(N, t)
    Fin_pad = _round_up(F_in, 128)
    Fout_pad = _round_up(F_out, 128)
    G_pad = _round_up(num_graphs, 8)
    nm = N_pad // t
    nk = N_pad // t

    # ------------------------- glue (plain JAX, once) -------------------------
    # Dense adjacency built directly in int8 (no f32 [N,N] intermediate) with
    # the "+H" residual folded in as the identity.  Requires edge multiplicity
    # + 1 <= 127.
    # TODO(synk): for large sparse graphs replace the dense [N,N] adjacency with
    # a CSR/gather path using PrefetchScalarGridSpec (O(E*F) instead of O(N^2*F)).
    src, dst = edge_index[0], edge_index[1]
    idx = jnp.arange(N)
    A = (jnp.zeros((N_pad, N_pad), jnp.int8)
         .at[dst, src].add(1)          # scatter_add(H[src], dst) == A @ H
         .at[idx, idx].add(1))         # "+ H" residual folded into A

    H_pad = jnp.zeros((N_pad, Fin_pad), f32).at[:N, :F_in].set(H).astype(bf16)
    W_pad_f32 = jnp.zeros((Fin_pad, Fout_pad), f32).at[:F_in, :F_out].set(W)
    W_pad = W_pad_f32.astype(bf16)

    counts = jax.ops.segment_sum(jnp.ones((N,), f32), batch, num_segments=num_graphs)
    counts = jnp.maximum(counts, 1.0)                     # guard empty graphs
    M = jnp.zeros((N_pad, G_pad), f32).at[idx, batch].set(1.0)
    counts_pad = jnp.ones((G_pad,), f32).at[:num_graphs].set(counts)
    M_scaled_T = (M / counts_pad[None, :]).T.astype(bf16)  # [G_pad, N_pad]
    M_bf16 = M.astype(bf16)

    # Keep all of H VMEM-resident in kernel 1 when it comfortably fits (so it
    # is DMA'd once instead of nm times); otherwise stream the k-chunk.
    h_resident = 2 * (N_pad * Fin_pad * 2) <= 24 * (1 << 20)

    # ---- kernel 1: y_pre = ((I + A) @ H) @ W  + partial per-graph means ----
    def msg_kernel(a_ref, h_ref, mst_ref, w_ref, ypre_ref, gs_ref, acc_ref):
        k = pl.program_id(1)

        @pl.when(k == 0)
        def _init():
            acc_ref[...] = jnp.zeros_like(acc_ref)

        if h_resident:
            hk = h_ref[pl.ds(pl.multiple_of(k * t, t), t), :]
        else:
            hk = h_ref[...]
        # int8 A upcast to bf16 on the VPU, f32 MXU accumulation.
        a = a_ref[...].astype(bf16)
        acc_ref[...] += jnp.dot(a, hk, preferred_element_type=jnp.float32)

        @pl.when(k == pl.num_programs(1) - 1)
        def _finalize():
            out1 = acc_ref[...]                       # [t, Fin_pad] f32
            out1_b = out1.astype(bf16)
            # Fused weight matmul: removes the out1 [N, Fin] bf16 HBM round-trip.
            ypre_ref[...] = jnp.dot(out1_b, w_ref[...],
                                    preferred_element_type=jnp.float32
                                    ).astype(ypre_ref.dtype)
            # Partial per-graph (scaled) sums for this row tile.
            # NOTE: only written at the last k; Pallas writes this output block
            # back to HBM when its block index changes (k is the innermost,
            # "arbitrary" axis), so this is correct as long as the grid order /
            # semantics are not reordered.
            gs_ref[...] = jnp.dot(mst_ref[...], out1_b,
                                  preferred_element_type=jnp.float32)[None]

    if h_resident:
        h_spec = pl.BlockSpec((N_pad, Fin_pad), lambda i, k: (0, 0))
        h_buf_rows = N_pad
    else:
        h_spec = pl.BlockSpec((t, Fin_pad), lambda i, k: (k, 0))
        h_buf_rows = t

    vmem1 = (2 * t * t * 1                      # A tiles (int8, double-buffered)
             + 2 * h_buf_rows * Fin_pad * 2     # H (bf16)
             + 2 * G_pad * t * 2                # (M/|G|)^T tile
             + 2 * Fin_pad * Fout_pad * 2       # W (resident)
             + 2 * t * Fout_pad * 2             # y_pre output
             + 2 * G_pad * Fin_pad * 4          # gs output
             + t * Fin_pad * 4)                 # f32 accumulator
    vmem1 = int(min(max(2 * vmem1, 32 << 20), 100 << 20))

    y_pre, gs_part = pl.pallas_call(
        msg_kernel,
        out_shape=(jax.ShapeDtypeStruct((N_pad, Fout_pad), bf16),
                   jax.ShapeDtypeStruct((nm, G_pad, Fin_pad), f32)),
        grid_spec=pltpu.PrefetchScalarGridSpec(
            num_scalar_prefetch=0,
            grid=(nm, nk),
            in_specs=[
                pl.BlockSpec((t, t), lambda i, k: (i, k)),               # A (int8)
                h_spec,                                                  # H
                pl.BlockSpec((G_pad, t), lambda i, k: (0, i)),           # (M/|G|)^T
                pl.BlockSpec((Fin_pad, Fout_pad), lambda i, k: (0, 0)),  # W
            ],
            out_specs=[
                pl.BlockSpec((t, Fout_pad), lambda i, k: (i, 0)),           # y_pre
                pl.BlockSpec((1, G_pad, Fin_pad), lambda i, k: (i, 0, 0)),  # gs
            ],
            scratch_shapes=[pltpu.VMEM((t, Fin_pad), jnp.float32)],
        ),
        compiler_params=pltpu.CompilerParams(
            dimension_semantics=("parallel", "arbitrary"),
            vmem_limit_bytes=vmem1),
    )(A, H_pad, M_scaled_T, W_pad)

    # Tiny reductions / matmul in plain JAX (negligible vs the main kernels).
    graph_mean = jnp.sum(gs_part, axis=0)                 # [G_pad, Fin_pad] f32
    gmW = jnp.dot(graph_mean, W_pad_f32).astype(bf16)     # [G_pad, Fout_pad]

    # ---- kernel 2: y = relu(y_pre + M @ (graph_mean @ W)), lane-dense bf16 ----
    def out_kernel(ypre_ref, m_ref, gmw_ref, y_ref):
        vn = jnp.dot(m_ref[...], gmw_ref[...],
                     preferred_element_type=jnp.float32)   # [t, Fout_pad]
        y = ypre_ref[...].astype(jnp.float32) + vn
        y_ref[...] = jnp.maximum(y, 0.0).astype(y_ref.dtype)

    vmem2 = (2 * t * Fout_pad * 2          # y_pre in
             + 2 * t * G_pad * 2           # M tile
             + 2 * G_pad * Fout_pad * 2    # gmW (resident)
             + 2 * t * Fout_pad * 2)       # y out
    vmem2 = int(min(max(2 * vmem2, 16 << 20), 100 << 20))

    y_pad = pl.pallas_call(
        out_kernel,
        out_shape=jax.ShapeDtypeStruct((N_pad, Fout_pad), bf16),
        grid_spec=pltpu.PrefetchScalarGridSpec(
            num_scalar_prefetch=0,
            grid=(nm,),
            in_specs=[
                pl.BlockSpec((t, Fout_pad), lambda i: (i, 0)),       # y_pre tile
                pl.BlockSpec((t, G_pad), lambda i: (i, 0)),          # membership
                pl.BlockSpec((G_pad, Fout_pad), lambda i: (0, 0)),   # graph_mean @ W
            ],
            out_specs=pl.BlockSpec((t, Fout_pad), lambda i: (i, 0)),
        ),
        compiler_params=pltpu.CompilerParams(
            dimension_semantics=("parallel",),
            vmem_limit_bytes=vmem2),
    )(y_pre, M_bf16, gmW)

    return y_pad[:N, :F_out]


def reference(H, edge_index, batch, W, num_graphs):
    """Pure-JAX f32 reference mirroring the PyTorch forward."""
    N = H.shape[0]
    src, dst = edge_index[0], edge_index[1]
    new_H = jax.ops.segment_sum(H[src], dst, num_segments=N)
    out = H + new_H
    sums = jax.ops.segment_sum(out, batch, num_segments=num_graphs)
    counts = jax.ops.segment_sum(jnp.ones((N,), H.dtype), batch,
                                 num_segments=num_graphs)
    vn_msg = sums / counts[:, None]
    out = out + vn_msg[batch]
    return jax.nn.relu(out @ W)


if __name__ == "__main__":
    key = jax.random.PRNGKey(0)
    k_h, k_w, k_src, k_dst = jax.random.split(key, 4)

    N, E = 16, 40              # nodes, edges
    in_features, out_features = 32, 32
    num_graphs = 2             # static (no host sync on jnp.max(batch))

    H = jax.random.normal(k_h, (N, in_features), dtype=jnp.float32)

    # Deterministic kaiming_normal_-style init for W [in_features, out_features].
    std = (2.0 / out_features) ** 0.5
    W = std * jax.random.normal(k_w, (in_features, out_features), dtype=jnp.float32)

    # Nodes split evenly into 2 graphs; random edges.
    batch = jnp.concatenate([jnp.zeros((N // 2,), jnp.int32),
                             jnp.ones((N - N // 2,), jnp.int32)])
    src = jax.random.randint(k_src, (E,), 0, N, dtype=jnp.int32)
    dst = jax.random.randint(k_dst, (E,), 0, N, dtype=jnp.int32)
    edge_index = jnp.stack([src, dst], axis=0)                 # [2, E]

    y = gcn_layer_with_virtual_node(H, edge_index, batch, W, num_graphs)
    y = jax.block_until_ready(y)

    y_ref = reference(H, edge_index, batch, W, num_graphs)
    assert y.shape == (N, out_features)

    # bf16 on the big matmul operands + bf16 output (f32 MXU accumulation)
    # -> ~1e-2 relative error vs the pure-f32 reference; structural bugs would
    # show up as O(1) errors.
    y_f32 = y.astype(jnp.float32)
    max_err = float(jnp.max(jnp.abs(y_f32 - y_ref)))
    assert jnp.allclose(y_f32, y_ref, atol=1e-1, rtol=5e-2), \
        f"mismatch vs reference, max abs err = {max_err}"

    print("KERNEL_OK")
</pallas_src>

<mosaic_0001>
module attributes {stable_mosaic.version = 11 : i64} {
  func.func @msg_kernel(%arg0: i32, %arg1: i32, %arg2: memref<128x128xi8, #tpu.memory_space<vmem>>, %arg3: memref<128x128xbf16, #tpu.memory_space<vmem>>, %arg4: memref<8x128xbf16, #tpu.memory_space<vmem>>, %arg5: memref<128x128xbf16, #tpu.memory_space<vmem>>, %arg6: memref<128x128xbf16, #tpu.memory_space<vmem>>, %arg7: memref<1x8x128xf32, #tpu.memory_space<vmem>>, %arg8: memref<128x128xf32, #tpu.memory_space<vmem>>) attributes {dimension_semantics = [#tpu.dimension_semantics<parallel>, #tpu.dimension_semantics<arbitrary>], iteration_bounds = array<i64: 1, 1>, scalar_prefetch = 0 : i64, scratch_operands = 1 : i64, tpu.core_type = #tpu.core_type<tc>, window_params = [{transform_indices = @transform_0, window_bounds = array<i64: 128, 128>}, {pipeline_mode = #tpu.pipeline_mode<synchronous>, transform_indices = @transform_1, window_bounds = array<i64: 128, 128>}, {transform_indices = @transform_2, window_bounds = array<i64: 8, 128>}, {pipeline_mode = #tpu.pipeline_mode<synchronous>, transform_indices = @transform_3, window_bounds = array<i64: 128, 128>}, {transform_indices = @transform_4, window_bounds = array<i64: 128, 128>}, {transform_indices = @transform_5, window_bounds = array<i64: 1, 8, 128>}]} {
    %c0_i32 = arith.constant 0 : i32
    %0 = arith.cmpi eq, %arg1, %c0_i32 : i32
    %1 = arith.extui %0 : i1 to i32
    %c0_i32_0 = arith.constant 0 : i32
    %2 = arith.cmpi ne, %1, %c0_i32_0 : i32
    scf.if %2 {
      %cst_9 = arith.constant 0.000000e+00 : f32
      %16 = vector.broadcast %cst_9 : f32 to vector<128x128xf32>
      %c0_10 = arith.constant 0 : index
      %c0_11 = arith.constant 0 : index
      %17 = vector.load %arg8[%c0_10, %c0_11] : memref<128x128xf32, #tpu.memory_space<vmem>>, vector<128x128xf32>
      tpu.vector_store %arg8[%c0_10, %c0_11], %16 {strides = array<i32>} : memref<128x128xf32, #tpu.memory_space<vmem>>, vector<128x128xf32>,
    } else {
    }
    %c128_i32 = arith.constant 128 : i32
    %3 = arith.muli %arg1, %c128_i32 : i32
    %4 = tpu.assume_multiple %3, 128 : i32
    %5 = arith.index_cast %4 : i32 to index
    %c0 = arith.constant 0 : index
    %6 = vector.load %arg3[%5, %c0] : memref<128x128xbf16, #tpu.memory_space<vmem>>, vector<128x128xbf16>
    %c0_1 = arith.constant 0 : index
    %c0_2 = arith.constant 0 : index
    %7 = vector.load %arg2[%c0_1, %c0_2] : memref<128x128xi8, #tpu.memory_space<vmem>>, vector<128x128xi8>
    %8 = arith.sitofp %7 : vector<128x128xi8> to vector<128x128xbf16>
    %c0_3 = arith.constant 0 : index
    %c0_4 = arith.constant 0 : index
    %9 = vector.load %arg8[%c0_3, %c0_4] : memref<128x128xf32, #tpu.memory_space<vmem>>, vector<128x128xf32>
    %cst = arith.constant dense<0.000000e+00> : vector<128x128xf32>
    %10 = tpu.matmul %8, %6, %cst {dimension_numbers = #tpu.dot_dimension_numbers<[1], [0], [0], [1], [0, 0, 1, 1], [], []>} : vector<128x128xbf16>, vector<128x128xbf16>, vector<128x128xf32> -> vector<128x128xf32>
    %11 = arith.addf %9, %10 : vector<128x128xf32>
    %c0_5 = arith.constant 0 : index
    %c0_6 = arith.constant 0 : index
    %12 = vector.load %arg8[%c0_5, %c0_6] : memref<128x128xf32, #tpu.memory_space<vmem>>, vector<128x128xf32>
    tpu.vector_store %arg8[%c0_5, %c0_6], %11 {strides = array<i32>} : memref<128x128xf32, #tpu.memory_space<vmem>>, vector<128x128xf32>,
    %c0_i32_7 = arith.constant 0 : i32
    %13 = arith.cmpi eq, %arg1, %c0_i32_7 : i32
    %14 = arith.extui %13 : i1 to i32
    %c0_i32_8 = arith.constant 0 : i32
    %15 = arith.cmpi ne, %14, %c0_i32_8 : i32
    scf.if %15 {
      %c0_9 = arith.constant 0 : index
      %c0_10 = arith.constant 0 : index
      %16 = vector.load %arg8[%c0_9, %c0_10] : memref<128x128xf32, #tpu.memory_space<vmem>>, vector<128x128xf32>
      %17 = arith.truncf %16 : vector<128x128xf32> to vector<128x128xbf16>
      %c0_11 = arith.constant 0 : index
      %c0_12 = arith.constant 0 : index
      %18 = vector.load %arg5[%c0_11, %c0_12] : memref<128x128xbf16, #tpu.memory_space<vmem>>, vector<128x128xbf16>
      %cst_13 = arith.constant dense<0.000000e+00> : vector<128x128xf32>
      %19 = tpu.matmul %17, %18, %cst_13 {dimension_numbers = #tpu.dot_dimension_numbers<[1], [0], [0], [1], [0, 0, 1, 1], [], []>} : vector<128x128xbf16>, vector<128x128xbf16>, vector<128x128xf32> -> vector<128x128xf32>
      %20 = arith.truncf %19 : vector<128x128xf32> to vector<128x128xbf16>
      %c0_14 = arith.constant 0 : index
      %c0_15 = arith.constant 0 : index
      %21 = vector.load %arg6[%c0_14, %c0_15] : memref<128x128xbf16, #tpu.memory_space<vmem>>, vector<128x128xbf16>
      tpu.vector_store %arg6[%c0_14, %c0_15], %20 {strides = array<i32>} : memref<128x128xbf16, #tpu.memory_space<vmem>>, vector<128x128xbf16>,
      %c0_16 = arith.constant 0 : index
      %c0_17 = arith.constant 0 : index
      %22 = vector.load %arg4[%c0_16, %c0_17] : memref<8x128xbf16, #tpu.memory_space<vmem>>, vector<8x128xbf16>
      %cst_18 = arith.constant dense<0.000000e+00> : vector<8x128xf32>
      %23 = tpu.matmul %22, %17, %cst_18 {dimension_numbers = #tpu.dot_dimension_numbers<[1], [0], [0], [1], [0, 0, 1, 1], [], []>} : vector<8x128xbf16>, vector<128x128xbf16>, vector<8x128xf32> -> vector<8x128xf32>
      %24 = vector.shape_cast %23 : vector<8x128xf32> to vector<1x8x128xf32>
      %c0_19 = arith.constant 0 : index
      %c0_20 = arith.constant 0 : index
      %c0_21 = arith.constant 0 : index
      %25 = vector.load %arg7[%c0_19, %c0_20, %c0_21] : memref<1x8x128xf32, #tpu.memory_space<vmem>>, vector<1x8x128xf32>
      tpu.vector_store %arg7[%c0_19, %c0_20, %c0_21], %24 {strides = array<i32>} : memref<1x8x128xf32, #tpu.memory_space<vmem>>, vector<1x8x128xf32>,
    } else {
    }
    return
  }
  func.func @transform_0(%arg0: i32, %arg1: i32) -> (i32, i32) {
    %c0_i32 = arith.constant 0 : i32
    return %arg0, %arg1 : i32, i32
  }
  func.func @transform_1(%arg0: i32, %arg1: i32) -> (i32, i32) {
    %c0_i32 = arith.constant 0 : i32
    %c0_i32_0 = arith.constant 0 : i32
    %c0_i32_1 = arith.constant 0 : i32
    return %c0_i32, %c0_i32_0 : i32, i32
  }
  func.func @transform_2(%arg0: i32, %arg1: i32) -> (i32, i32) {
    %c0_i32 = arith.constant 0 : i32
    %c0_i32_0 = arith.constant 0 : i32
    return %c0_i32, %arg0 : i32, i32
  }
  func.func @transform_3(%arg0: i32, %arg1: i32) -> (i32, i32) {
    %c0_i32 = arith.constant 0 : i32
    %c0_i32_0 = arith.constant 0 : i32
    %c0_i32_1 = arith.constant 0 : i32
    return %c0_i32, %c0_i32_0 : i32, i32
  }
  func.func @transform_4(%arg0: i32, %arg1: i32) -> (i32, i32) {
    %c0_i32 = arith.constant 0 : i32
    %c0_i32_0 = arith.constant 0 : i32
    return %arg0, %c0_i32 : i32, i32
  }
  func.func @transform_5(%arg0: i32, %arg1: i32) -> (i32, i32, i32) {
    %c0_i32 = arith.constant 0 : i32
    %c0_i32_0 = arith.constant 0 : i32
    %c0_i32_1 = arith.constant 0 : i32
    return %arg0, %c0_i32, %c0_i32_0 : i32, i32, i32
  }
}

</mosaic_0001>

<bundles_post_ra>
// kernel: tpu_custom_call.1
= control target key start
LH: loop header
LB: loop body
LE: loop exit
PB: predicated region body
PF: predicated region fallthrough
CT: control target
= control target key end

     0   :  { %11 = vsyncpa [#allocation4], 0  ;;  %s1138_s0 = inlined_call_operand.hbm [shape: s8[128,128], index: 0, kind: input, shape index: {}]   ;;  %s1139_s1 = inlined_call_operand.hbm [shape: bf16[128,128], index: 1, kind: input, shape index: {}]   ;;  %s1140_s2 = inlined_call_operand.vmem [shape: bf16[8,128], index: 2, kind: input, shape index: {}]   ;;  %s1141_s3 = inlined_call_operand.hbm [shape: bf16[128,128], index: 3, kind: input, shape index: {}]   ;;  %s1142_s4 = inlined_call_operand.hbm [shape: bf16[128,128], index: 4, kind: output, shape index: {0}]   ;;  %s1143_s5 = inlined_call_operand.hbm [shape: f32[1,8,128], index: 5, kind: output, shape index: {1}]  }
   0x1   :  { %12 = vsyncpa [#allocation7], 0 }
   0x2   :  { %13 = vsyncpa [#allocation5], 0 }
   0x3   :  { %14 = vsyncpa [#allocation11], 0  ;;  %s1018_s18 = smov [#allocation6]   ;;  %s900_s22 = scalar_lea.hbm %s1139_s1, 1024 }
   0x4   :  { %s32_s19 = sshll.u32 %s1018_s18, 4  ;;  %p901_p0 = scmp.ne.s32.totalorder %s1139_s1, %s900_s22  ;;  %s33_s19 = int_to_ptr.vmem [resolvable:$true] %s32_s19 }
   0x5   :  { %p904_p1 = scmp.lt.u32.totalorder %s900_s22, %s1139_s1 }
   0x7   :  { %p906_p2 = pnand %p904_p1, %p901_p0 }
   0x9   :  { %909 = shalt.err (!%p906_p2)
}
   0xa   :  { %s910_s27 = scalar_lea.vmem %s33_s19, 1024  ;;  %p915_p4 = scmp.lt.s32.totalorder %s33_s19, %s33_s19 }
   0xb   :  { %p911_p3 = scmp.ne.s32.totalorder %s33_s19, %s910_s27  ;;  %p916_p5 = scmp.lt.s32.totalorder %s910_s27, %s910_s27 }
   0xd   :  { %p917_p6 = por %p916_p5, %p915_p4 }
   0xf   :  { %p918_p7 = pnand %p917_p6, %p911_p3 }
  0x11   :  { %921 = shalt.err (!%p918_p7)
}
  0x12   :  { %s1019_s28 = smov 64   ;;  %s1020_s29 = smov 4  }
  0x13   :  { %38 = dma.hbm_to_vmem [thread:$0]  %s1139_s1, 1024, %s33_s19, [#allocation7], %s1019_s28, %s1019_s28, %s1020_s29  }
  0x14   :  { %s1021_s7 = smov [#allocation3]   ;;  %s922_s11 = scalar_lea.hbm %s1138_s0, 512 }
  0x15   :  { %s20_s8 = sshll.u32 %s1021_s7, 4  ;;  %p923_p8 = scmp.ne.s32.totalorder %s1138_s0, %s922_s11  ;;  %s21_s8 = int_to_ptr.vmem [resolvable:$true] %s20_s8 }
  0x16   :  { %p926_p9 = scmp.lt.u32.totalorder %s922_s11, %s1138_s0 }
  0x18   :  { %p928_p10 = pnand %p926_p9, %p923_p8 }
  0x1a   :  { %931 = shalt.err (!%p928_p10)
}
  0x1b   :  { %s932_s16 = scalar_lea.vmem %s21_s8, 512  ;;  %p937_p12 = scmp.lt.s32.totalorder %s21_s8, %s21_s8 }
  0x1c   :  { %p933_p11 = scmp.ne.s32.totalorder %s21_s8, %s932_s16  ;;  %p938_p13 = scmp.lt.s32.totalorder %s932_s16, %s932_s16 }
  0x1e   :  { %p939_p0 = por %p938_p13, %p937_p12 }
  0x20   :  { %p940_p1 = pnand %p939_p0, %p933_p11 }
  0x22   :  { %943 = shalt.err (!%p940_p1)
}
  0x23   :  { %s1022_s1 = smov 128   ;;  %s1023_s17 = smov 8  }
  0x24   :  { %26 = dma.hbm_to_vmem [thread:$0]  %s1138_s0, 512, %s21_s8, [#allocation4], %s1022_s1, %s1022_s1, %s1023_s17  }
  0x25   :  { %s1024_s20 = smov [#allocation8]   ;;  %s944_s24 = scalar_lea.hbm %s1141_s3, 1024 }
  0x26   :  { %s46_s21 = sshll.u32 %s1024_s20, 4  ;;  %p945_p2 = scmp.ne.s32.totalorder %s1141_s3, %s944_s24  ;;  %s47_s21 = int_to_ptr.vmem [resolvable:$true] %s46_s21 }
  0x27   :  { %p948_p3 = scmp.lt.u32.totalorder %s944_s24, %s1141_s3 }
  0x29   :  { %p950_p4 = pnand %p948_p3, %p945_p2 }
  0x2b   :  { %953 = shalt.err (!%p950_p4)
}
  0x2c   :  { %s954_s6 = scalar_lea.vmem %s47_s21, 1024  ;;  %p959_p6 = scmp.lt.s32.totalorder %s47_s21, %s47_s21 }
  0x2d   :  { %p955_p5 = scmp.ne.s32.totalorder %s47_s21, %s954_s6  ;;  %p960_p7 = scmp.lt.s32.totalorder %s954_s6, %s954_s6 }
  0x2f   :  { %p961_p8 = por %p960_p7, %p959_p6 }
  0x31   :  { %p962_p9 = pnand %p961_p8, %p955_p5 }
  0x33   :  { %965 = shalt.err (!%p962_p9)
}
  0x34   :  { %52 = dma.hbm_to_vmem [thread:$0]  %s1141_s3, 1024, %s47_s21, [#allocation7], %s1019_s28, %s1019_s28, %s1020_s29  }
  0x35   :  { %1010 = dma.done.wait [#allocation4], 512  }
  0x36   :  { %1011 = vsyncadd [#allocation4], 4294966784 }
  0x37   :  { %1012 = dma.done.wait [#allocation7], 2048  }
  0x38   :  { %1013 = vsyncadd [#allocation7], 4294965248  ;;  %v884_v0 = vld [vmem:[#allocation6] sm:$0xff]   ;;  %v885_v1 = vld [vmem:[#allocation6 + $0x8] sm:$0xff]   ;;  %v1025_v28 = vmov 0.0   ;;  %vm1026_vm0 = vmmov 0  }
  0x39   :  { %789 = vmatprep.subr.bf16.mxu0 %v884_v0  ;;  %v886_v2 = vld [vmem:[#allocation6 + $0x10] sm:$0xff]   ;;  %v887_v3 = vld [vmem:[#allocation6 + $0x18] sm:$0xff]   ;;  %v104_v4 = vld [vmem:[#allocation3] sm:$0xff]  ;;  %s1028_s10 = smov [#allocation10]  }
  0x3a   :  { %790 = vmatpush3.bf16.msra.mxu0 %v884_v0  ;;  %v108_v5 = vunpack.c.l.s8.bf16 %v104_v4  ;;  %v892_v6 = vld [vmem:[#allocation8] sm:$0xff]   ;;  %v893_v7 = vld [vmem:[#allocation8 + $0x8] sm:$0xff]   ;;  %v894_v9 = vld [vmem:[#allocation8 + $0x10] sm:$0xff]   ;;  %v109_v17 = vunpack.c.h.s8.bf16 %v104_v4  ;;  %s637_s11 = sshll.u32 %s1028_s10, 4  ;;  %s1104_s11 = int_to_ptr.vmem [resolvable:$true] %s637_s11 }
  0x3b   :  { %791 = vmatprep.subr.bf16.mxu0 %v885_v1  ;;  %v888_v8 = vld [vmem:[#allocation6 + $0x20] sm:$0xff]   ;;  %821 = vmatprep.subr.bf16.mxu1 %v892_v6  ;;  %v889_v10 = vld [vmem:[#allocation6 + $0x28] sm:$0xff]   ;;  %v895_v11 = vld [vmem:[#allocation8 + $0x18] sm:$0xff]  }
  0x3c   :  { %805 = vmatprep.mubr.bf16.mxu0 %v108_v5  ;;  %822 = vmatpush3.bf16.msra.mxu1 %v892_v6  ;;  %v890_v12 = vld [vmem:[#allocation6 + $0x30] sm:$0xff]   ;;  %v896_v13 = vld [vmem:[#allocation8 + $0x20] sm:$0xff]   ;;  %v891_v14 = vld [vmem:[#allocation6 + $0x38] sm:$0xff]  }
  0x3d   :  { %823 = vmatprep.subr.bf16.mxu1 %v893_v7  ;;  %v897_v15 = vld [vmem:[#allocation8 + $0x28] sm:$0xff]   ;;  %v898_v18 = vld [vmem:[#allocation8 + $0x30] sm:$0xff]   ;;  %v107_v23 = vld [vmem:[#allocation3 + $0x18] sm:$0xff] }
  0x3e   :  { %792 = vmatpush3.bf16.msra.mxu0 %v885_v1  ;;  %v105_v16 = vld [vmem:[#allocation3 + $0x8] sm:$0xff]  ;;  %v106_v20 = vld [vmem:[#allocation3 + $0x10] sm:$0xff]  ;;  %v114_v25 = vunpack.c.l.s8.bf16 %v107_v23  ;;  %v115_v26 = vunpack.c.h.s8.bf16 %v107_v23  ;;  %v899_v27 = vld [vmem:[#allocation8 + $0x38] sm:$0xff]  }
  0x3f   :  { %793 = vmatprep.subr.bf16.mxu0 %v886_v2  ;;  %v110_v19 = vunpack.c.l.s8.bf16 %v105_v16  ;;  %v111_v21 = vunpack.c.h.s8.bf16 %v105_v16  ;;  %v112_v22 = vunpack.c.l.s8.bf16 %v106_v20  ;;  %v113_v24 = vunpack.c.h.s8.bf16 %v106_v20  ;;  %v577_v53 = vld [vmem:[%s1140_s2] sm:$0xf]  ;;  %s1027_s2 = smov [#allocation9]  }
  0x40   :  { %824 = vmatpush3.bf16.msra.mxu1 %v893_v7  ;;  %s624_s9 = sshll.u32 %s1027_s2, 4  ;;  %s625_s9 = int_to_ptr.vmem [resolvable:$true] %s624_s9 }
  0x41   :  { %825 = vmatprep.subr.bf16.mxu1 %v894_v9  ;;  %s966_s12 = scalar_lea.vmem %s625_s9, 1024  ;;  %p971_p11 = scmp.lt.s32.totalorder %s625_s9, %s625_s9 }
  0x42   :  { %794 = vmatpush3.bf16.msra.mxu0 %v886_v2  ;;  %p967_p10 = scmp.ne.s32.totalorder %s625_s9, %s966_s12  ;;  %p972_p12 = scmp.lt.s32.totalorder %s966_s12, %s966_s12 }
  0x43   :  { %795 = vmatprep.subr.bf16.mxu0 %v887_v3 }
  0x44   :  { %826 = vmatpush3.bf16.msra.mxu1 %v894_v9  ;;  %p973_p13 = por %p972_p12, %p971_p11 }
  0x45   :  { %827 = vmatprep.subr.bf16.mxu1 %v895_v11 }
  0x46   :  { %796 = vmatpush3.bf16.msra.mxu0 %v887_v3  ;;  %p974_p0 = pnand %p973_p13, %p967_p10 }
  0x47   :  { %797 = vmatprep.subr.bf16.mxu0 %v888_v8 }
  0x48   :  { %828 = vmatpush3.bf16.msra.mxu1 %v895_v11 }
  0x49   :  { %829 = vmatprep.subr.bf16.mxu1 %v896_v13 }
  0x4a   :  { %798 = vmatpush3.bf16.msra.mxu0 %v888_v8 }
  0x4b   :  { %799 = vmatprep.subr.bf16.mxu0 %v889_v10 }
  0x4c   :  { %830 = vmatpush3.bf16.msra.mxu1 %v896_v13 }
  0x4d   :  { %831 = vmatprep.subr.bf16.mxu1 %v897_v15 }
  0x4e   :  { %800 = vmatpush3.bf16.msra.mxu0 %v889_v10 }
  0x4f   :  { %801 = vmatprep.subr.bf16.mxu0 %v890_v12 }
  0x50   :  { %832 = vmatpush3.bf16.msra.mxu1 %v897_v15 }
  0x51   :  { %833 = vmatprep.subr.bf16.mxu1 %v898_v18 }
  0x52   :  { %802 = vmatpush3.bf16.msra.mxu0 %v890_v12 }
  0x53   :  { %803 = vmatprep.subr.bf16.mxu0 %v891_v14 }
  0x54   :  { %834 = vmatpush3.bf16.msra.mxu1 %v898_v18 }
  0x55   :  { %835 = vmatprep.subr.bf16.mxu1 %v899_v27 }
  0x56   :  { %804 = vmatpush3.bf16.msra.mxu0 %v891_v14 }
  0x57   :  { %853 = vmatprep.subr.bf16.mxu0 %v1025_v28 }
  0x58   :  { %836 = vmatpush3.bf16.msra.mxu1 %v899_v27 }
  0x59   :  { %806 = vmatmul.mubr.bf16.vlgmr.msra.gmra.mrb[0].mxu0 %v109_v17 }
  0x5a   :  { %809 = vmatprep.mubr.bf16.mxu0 %v110_v19 }
  0x61   :  { %810 = vmatmul.mubr.bf16.gmra.mrb[4].mxu0 %v111_v21 }
  0x62   :  { %813 = vmatprep.mubr.bf16.mxu0 %v112_v22 }
  0x69   :  { %814 = vmatmul.mubr.bf16.gmra.mrb[8].mxu0 %v113_v24 }
  0x6a   :  { %817 = vmatprep.mubr.bf16.mxu0 %v114_v25 }
  0x71   :  { %818 = vmatmul.mubr.bf16.gmra.mrb[12].mxu0 %v115_v26 }
  0x72   :  { %869 = vmatprep.mubr.msk.bf16.mxu0 %vm1026_vm0, %v1025_v28 }
 0x12c   :  { %v807_v29 = vpop.f32.mrb[0].mxu0 }
 0x12d   :  { %v214_v30 = vpop.f32.mrb[1].mxu0 }
 0x12e   :  { %v808_v31 = vpop.f32.mrb[2].mxu0 }
 0x12f   :  { %v329_v32 = vpack.c.bf16 %v808_v31, %v807_v29  ;;  %v217_v33 = vpop.f32.mrb[3].mxu0 }
 0x130   :  { %v328_v34 = vpack.c.bf16 %v217_v33, %v214_v30 }
 0x132   :  { %837 = vmatprep.mubr.bf16.mxu1 %v328_v34  ;;  %854 = vmatpush3.bf16.msra.mxu0 %v328_v34 }
 0x133   :  { %838 = vmatmul.mubr.bf16.vlgmr.msra.gmra.mrb[0].mxu1 %v329_v32  ;;  %855 = vmatprep.subr.bf16.mxu0 %v1025_v28 }
 0x134   :  { %v811_v35 = vpop.f32.mrb[4].mxu0 }
 0x135   :  { %v230_v36 = vpop.f32.mrb[5].mxu0 }
 0x136   :  { %v812_v37 = vpop.f32.mrb[6].mxu0  ;;  %856 = vmatpush3.bf16.msra.mxu0 %v329_v32 }
 0x137   :  { %v331_v38 = vpack.c.bf16 %v812_v37, %v811_v35  ;;  %v233_v39 = vpop.f32.mrb[7].mxu0  ;;  %857 = vmatprep.subr.bf16.mxu0 %v1025_v28 }
 0x138   :  { %v330_v40 = vpack.c.bf16 %v233_v39, %v230_v36 }
 0x13a   :  { %841 = vmatprep.mubr.bf16.mxu1 %v330_v40  ;;  %858 = vmatpush3.bf16.msra.mxu0 %v330_v40 }
 0x13b   :  { %842 = vmatmul.mubr.bf16.gmra.mrb[4].mxu1 %v331_v38  ;;  %859 = vmatprep.subr.bf16.mxu0 %v1025_v28 }
 0x13c   :  { %v815_v41 = vpop.f32.mrb[8].mxu0 }
 0x13d   :  { %v246_v42 = vpop.f32.mrb[9].mxu0 }
 0x13e   :  { %v816_v43 = vpop.f32.mrb[10].mxu0  ;;  %860 = vmatpush3.bf16.msra.mxu0 %v331_v38 }
 0x13f   :  { %v333_v44 = vpack.c.bf16 %v816_v43, %v815_v41  ;;  %v249_v45 = vpop.f32.mrb[11].mxu0  ;;  %861 = vmatprep.subr.bf16.mxu0 %v1025_v28 }
 0x140   :  { %v332_v46 = vpack.c.bf16 %v249_v45, %v246_v42 }
 0x142   :  { %845 = vmatprep.mubr.bf16.mxu1 %v332_v46  ;;  %862 = vmatpush3.bf16.msra.mxu0 %v332_v46 }
 0x143   :  { %846 = vmatmul.mubr.bf16.gmra.mrb[8].mxu1 %v333_v44  ;;  %863 = vmatprep.subr.bf16.mxu0 %v1025_v28 }
 0x144   :  { %v819_v47 = vpop.f32.mrb[12].mxu0 }
 0x145   :  { %v262_v48 = vpop.f32.mrb[13].mxu0 }
 0x146   :  { %v820_v49 = vpop.f32.mrb[14].mxu0  ;;  %864 = vmatpush3.bf16.msra.mxu0 %v333_v44 }
 0x147   :  { %v335_v50 = vpack.c.bf16 %v820_v49, %v819_v47  ;;  %v265_v51 = vpop.f32.mrb[15].mxu0  ;;  %865 = vmatprep.subr.bf16.mxu0 %v1025_v28 }
 0x148   :  { %v334_v52 = vpack.c.bf16 %v265_v51, %v262_v48 }
 0x14a   :  { %849 = vmatprep.mubr.bf16.mxu1 %v334_v52  ;;  %866 = vmatpush3.bf16.msra.mxu0 %v334_v52 }
 0x14b   :  { %850 = vmatmul.mubr.bf16.gmra.mrb[12].mxu1 %v335_v50  ;;  %867 = vmatprep.subr.bf16.mxu0 %v1025_v28 }
 0x14e   :  { %868 = vmatpush3.bf16.msra.mxu0 %v335_v50 }
 0x151   :  { %870 = vmatmul.mubr.bf16.vlgmr.msra.gmra.mrb[16].mxu0 %v577_v53 }
 0x206   :  { %v839_v54 = vpop.f32.mrb[0].mxu1 }
 0x207   :  { %v434_v55 = vpop.f32.mrb[1].mxu1 }
 0x208   :  { %v840_v56 = vpop.f32.mrb[2].mxu1 }
 0x209   :  { %v709_v57 = vpack.c.bf16 %v840_v56, %v839_v54  ;;  %v437_v58 = vpop.f32.mrb[3].mxu1 }
 0x20a   :  { %v704_v59 = vpack.c.bf16 %v437_v58, %v434_v55 }
 0x20b   :  { %741 = vst [vmem:[#allocation9 + $0x8] sm:$0xff] %v709_v57  }
 0x20c   :  { %705 = vst [vmem:[#allocation9] sm:$0xff] %v704_v59  }
 0x20e   :  { %v843_v60 = vpop.f32.mrb[4].mxu1 }
 0x20f   :  { %v450_v61 = vpop.f32.mrb[5].mxu1 }
 0x210   :  { %v844_v62 = vpop.f32.mrb[6].mxu1 }
 0x211   :  { %v719_v63 = vpack.c.bf16 %v844_v62, %v843_v60  ;;  %v453_v0 = vpop.f32.mrb[7].mxu1 }
 0x212   :  { %v714_v1 = vpack.c.bf16 %v453_v0, %v450_v61 }
 0x213   :  { %743 = vst [vmem:[#allocation9 + $0x18] sm:$0xff] %v719_v63  }
 0x214   :  { %742 = vst [vmem:[#allocation9 + $0x10] sm:$0xff] %v714_v1  }
 0x216   :  { %v847_v2 = vpop.f32.mrb[8].mxu1 }
 0x217   :  { %v466_v3 = vpop.f32.mrb[9].mxu1 }
 0x218   :  { %v848_v4 = vpop.f32.mrb[10].mxu1 }
 0x219   :  { %v729_v5 = vpack.c.bf16 %v848_v4, %v847_v2  ;;  %v469_v6 = vpop.f32.mrb[11].mxu1 }
 0x21a   :  { %v724_v7 = vpack.c.bf16 %v469_v6, %v466_v3 }
 0x21b   :  { %745 = vst [vmem:[#allocation9 + $0x28] sm:$0xff] %v729_v5  }
 0x21c   :  { %744 = vst [vmem:[#allocation9 + $0x20] sm:$0xff] %v724_v7  }
 0x21e   :  { %v851_v8 = vpop.f32.mrb[12].mxu1 }
 0x21f   :  { %v482_v9 = vpop.f32.mrb[13].mxu1 }
 0x220   :  { %v852_v10 = vpop.f32.mrb[14].mxu1 }
 0x221   :  { %v739_v11 = vpack.c.bf16 %v852_v10, %v851_v8  ;;  %v485_v12 = vpop.f32.mrb[15].mxu1 }
 0x222   :  { %v734_v13 = vpack.c.bf16 %v485_v12, %v482_v9 }
 0x223   :  { %747 = vst [vmem:[#allocation9 + $0x38] sm:$0xff] %v739_v11  }
 0x224   :  { %746 = vst [vmem:[#allocation9 + $0x30] sm:$0xff] %v734_v13   ;;  %v612_v14 = vpop.f32.mrb[16].mxu0 }
 0x225   :  { %618 = vst [vmem:[#allocation10] sm:$0xff] %v612_v14  ;;  %v871_v15 = vpop.f32.mrb[17].mxu0 }
 0x226   :  { %977 = shalt.err (!%p974_p0)
}
 0x227   :  { %s978_s15 = scalar_lea.hbm %s1142_s4, 1024 }
 0x228   :  { %p979_p1 = scmp.ne.s32.totalorder %s1142_s4, %s978_s15  ;;  %p982_p2 = scmp.lt.u32.totalorder %s978_s15, %s1142_s4 }
 0x22a   :  { %p984_p3 = pnand %p982_p2, %p979_p1 }
 0x22c   :  { %987 = shalt.err (!%p984_p3)
}
 0x22d   :  { %630 = dma.vmem_to_hbm [thread:$0]  %s625_s9, 1024, %s1142_s4, [#allocation5], %s1019_s28, %s1019_s28, %s1020_s29   ;;  %v615_v16 = vpop.f32.mrb[18].mxu0 }
 0x22e   :  { %s988_s21 = scalar_lea.vmem %s1104_s11, 128  ;;  %p993_p5 = scmp.lt.s32.totalorder %s1104_s11, %s1104_s11 }
 0x22f   :  { %p989_p4 = scmp.ne.s32.totalorder %s1104_s11, %s988_s21  ;;  %p994_p6 = scmp.lt.s32.totalorder %s988_s21, %s988_s21 }
 0x231   :  { %p995_p7 = por %p994_p6, %p993_p5 }
 0x233   :  { %p996_p8 = pnand %p995_p7, %p989_p4 }
 0x235   :  { %999 = shalt.err (!%p996_p8)
}
 0x236   :  { %s1000_s24 = scalar_lea.hbm %s1143_s5, 128 }
 0x237   :  { %p1001_p9 = scmp.ne.s32.totalorder %s1143_s5, %s1000_s24  ;;  %p1004_p10 = scmp.lt.u32.totalorder %s1000_s24, %s1143_s5 }
 0x239   :  { %p1006_p11 = pnand %p1004_p10, %p1001_p9 }
 0x23b   :  { %1009 = shalt.err (!%p1006_p11)
}
 0x23c   :  { %640 = dma.vmem_to_hbm [thread:$0]  %s1104_s11, 128, %s1143_s5, [#allocation11]   ;;  %v872_v17 = vpop.f32.mrb[19].mxu0 }
 0x23d   :  { %1014 = dma.done.wait [#allocation5], 1024  }
 0x23e   :  { %1015 = vsyncadd [#allocation5], 4294966272 }
 0x23f   :  { %1016 = dma.done.wait [#allocation11], 128  }
 0x240   :  { %1017 = vsyncadd [#allocation11], 4294967168 }
 0x241   :  { %647 = vsyncpa [#allocation4], 1 }
 0x242   :  { %648 = vsyncpa [#allocation7], 1 }
 0x243   :  { %649 = vsyncpa [#allocation5], 1 }
 0x244   :  { %650 = vsyncpa [#allocation11], 1 }

</bundles_post_ra>
